<compile_context>
chip_gen: v7x
topology: tpu7x:2x2x1
jax: 0.10.0
libtpu: 0.0.40
codegen_flags: <defaults>
</compile_context>

<pallas_src>
import functools
import math

import jax
import jax.numpy as jnp
from jax import lax
from jax.experimental import pallas as pl
from jax.experimental.pallas import tpu as pltpu


_HUGE_NORM = 1e30  # padded-row squared-norm sentinel


def _round_up(x, m):
    return ((x + m - 1) // m) * m


def _make_mmd_kernel(loss_type, TM, alpha, bu, bl, precision):
    """Builds the upper-triangular tiled MMD kernel (all args compile-time)."""

    def kernel(si_ref, sj_ref, ti_ref, tj_ref,
               si_rn_ref, sj_cn_ref, ti_rn_ref, tj_cn_ref,
               sj_rn_ref, ti_cn_ref,
               oxx_ref, oyy_ref, oxy_ref):
        i = pl.program_id(0)
        j = pl.program_id(1)

        @pl.when(j == 0)
        def _init():
            oxx_ref[...] = jnp.zeros_like(oxx_ref)
            oyy_ref[...] = jnp.zeros_like(oyy_ref)
            oxy_ref[...] = jnp.zeros_like(oxy_ref)

        # K_XX / K_YY are symmetric -> only process upper-triangular tiles.
        @pl.when(j >= i)
        def _compute():
            si = si_ref[...]          # (TM, D_pad) source row block
            sj = sj_ref[...]          # (TM, D_pad) source col block
            ti = ti_ref[...]          # (TM, D_pad) target row block
            tj = tj_ref[...]          # (TM, D_pad) target col block

            def gram(x, y):           # x @ y.T on the MXU, f32 accumulate
                return lax.dot_general(
                    x, y, (((1,), (1,)), ((), ())),
                    preferred_element_type=jnp.float32, precision=precision)

            def d2(g, rn, cn):        # ||x_r - y_c||^2 via the Gram identity
                return jnp.maximum(rn + cn - 2.0 * g, 0.0)

            def colsum(k):            # lane-dense (1, 1, TM) partial sums
                return jnp.sum(k, axis=0, keepdims=True)[jnp.newaxis]

            d2_xx = d2(gram(si, sj), si_rn_ref[...], sj_cn_ref[...])
            d2_yy = d2(gram(ti, tj), ti_rn_ref[...], tj_cn_ref[...])
            if loss_type == "critic":
                kxx = jnp.exp(-alpha * jnp.minimum(d2_xx, bu))
                kyy = jnp.exp(-alpha * jnp.maximum(d2_yy, bl))
            else:
                kxx = jnp.exp(-alpha * d2_xx)
                kyy = jnp.exp(-alpha * d2_yy)

            def kxy(x, x_rn_ref, y, y_cn_ref):
                return jnp.exp(-alpha * d2(gram(x, y),
                                           x_rn_ref[...], y_cn_ref[...]))

            is_diag = i == j

            @pl.when(is_diag)
            def _diag_tile():
                # Exclude the self-pair diagonal exactly (the reference
                # subtracts it); padded diagonal entries are killed too.
                r = lax.broadcasted_iota(jnp.int32, (TM, TM), 0)
                c = lax.broadcasted_iota(jnp.int32, (TM, TM), 1)
                eye = r == c
                oxx_ref[...] += colsum(jnp.where(eye, 0.0, kxx))
                oyy_ref[...] += colsum(jnp.where(eye, 0.0, kyy))
                if loss_type == "gen":
                    oxy_ref[...] += colsum(kxy(si, si_rn_ref, tj, tj_cn_ref))

            @pl.when(i != j)
            def _upper_tile():
                # Off-diagonal block (i, j), j > i: its transpose block (j, i)
                # has the same grand sum, so accumulate with weight 2.
                oxx_ref[...] += 2.0 * colsum(kxx)
                oyy_ref[...] += 2.0 * colsum(kyy)
                if loss_type == "gen":
                    # K_XY is not symmetric -> compute both the (i, j) and the
                    # (j, i) blocks; all four operand blocks are already in VMEM.
                    oxy_ref[...] += (colsum(kxy(si, si_rn_ref, tj, tj_cn_ref))
                                     + colsum(kxy(sj, sj_rn_ref, ti, ti_cn_ref)))

    return kernel


@functools.partial(jax.jit, static_argnames=("loss_type", "bu", "bl", "fix_sigma"))
def mmd_loss(source, target, loss_type="gen", bu=4.0, bl=0.25, fix_sigma=1.0):
    if loss_type not in ("critic", "gen"):
        raise ValueError(f"unknown loss_type: {loss_type!r}")
    M, D = source.shape
    if target.shape[0] != M:         # mirrors the PyTorch module: target[:M]
        target = target[:M, :]
    alpha = 1.0 / (2.0 * float(fix_sigma))
    itemsize = source.dtype.itemsize

    D_pad = _round_up(D, 128)        # lane-dense feature dim

    def vmem_need(tm):
        data = 4 * 2 * tm * D_pad * itemsize     # 4 data inputs, double-buffered
        inter = 10 * tm * tm * 4                 # (TM,TM) f32 intermediates
        small = 2 * 9 * tm * 4 * 2               # norm + output blocks
        return data + inter + small

    VMEM_BUDGET = 40 << 20
    if M <= 256:
        TM = _round_up(max(M, 1), 8)             # single tile: block == full dims
        M_pad = TM
    else:
        # 128-multiple tiles keep every lane-dim block aligned; pick the one
        # that minimizes padding (ties -> larger tile) within the VMEM budget.
        cands = [tm for tm in (256, 128) if vmem_need(tm) <= VMEM_BUDGET] or [128]
        TM = min(cands, key=lambda tm: (_round_up(M, tm), -tm))
        M_pad = _round_up(M, TM)
        # TODO(synk): for very large D (block buffers >> 40 MiB) add a
        # K-chunking grid axis over D instead of shrinking TM further.
    gi = M_pad // TM

    # Pad with zero rows/cols and precompute squared row norms once.
    src = jnp.pad(source, ((0, M_pad - M), (0, D_pad - D)))
    tgt = jnp.pad(target, ((0, M_pad - target.shape[0]), (0, D_pad - D)))

    valid = jnp.arange(M_pad) < M

    def norms(x):
        n = jnp.sum(x.astype(jnp.float32) ** 2, axis=1)
        # Padded rows get a huge norm so exp(-alpha*d2) underflows to exactly 0;
        # for critic-XX the min(d2, bu) clamp makes them exactly exp(-alpha*bu).
        n = jnp.where(valid, n, jnp.float32(_HUGE_NORM))
        return n.reshape(M_pad, 1), n.reshape(1, M_pad)

    s_rn, s_cn = norms(src)
    t_rn, t_cn = norms(tgt)

    # Mosaic dot lowering supports DEFAULT / HIGHEST only (no HIGH / bf16_3x).
    precision = (lax.Precision.HIGHEST if src.dtype == jnp.float32
                 else lax.Precision.DEFAULT)

    kernel = _make_mmd_kernel(loss_type, TM, alpha, float(bu), float(bl), precision)

    dspec_row = pl.BlockSpec((TM, D_pad), lambda i, j: (i, 0))
    # Column blocks use max(i, j): on skipped lower-triangular steps the block
    # index does not change, so Pallas elides the (wasted) re-fetch.
    dspec_col = pl.BlockSpec((TM, D_pad), lambda i, j: (jnp.maximum(i, j), 0))
    rn_i = pl.BlockSpec((TM, 1), lambda i, j: (i, 0))
    rn_j = pl.BlockSpec((TM, 1), lambda i, j: (jnp.maximum(i, j), 0))
    cn_i = pl.BlockSpec((1, TM), lambda i, j: (0, i))
    cn_j = pl.BlockSpec((1, TM), lambda i, j: (0, jnp.maximum(i, j)))
    out_spec = pl.BlockSpec((1, 1, TM), lambda i, j: (i, 0, 0))
    out_shape = jax.ShapeDtypeStruct((gi, 1, TM), jnp.float32)

    vmem_limit = int(min(max(vmem_need(TM) + (8 << 20), 24 << 20), 48 << 20))

    out_xx, out_yy, out_xy = pl.pallas_call(
        kernel,
        out_shape=(out_shape, out_shape, out_shape),
        grid=(gi, gi),
        in_specs=[dspec_row, dspec_col, dspec_row, dspec_col,
                  rn_i, cn_j, rn_i, cn_j, rn_j, cn_i],
        out_specs=(out_spec, out_spec, out_spec),
        compiler_params=pltpu.CompilerParams(
            # i rows are independent (per-i output blocks) -> megacore-parallel
            # on v7x; j is the reduction axis.
            dimension_semantics=("parallel", "arbitrary"),
            vmem_limit_bytes=vmem_limit,
        ),
    )(src, src, tgt, tgt, s_rn, s_cn, t_rn, t_cn, s_rn, t_cn)

    # Tiny finalize in plain JAX (keeps the kernel's i axis parallelizable).
    m = float(M)
    # TODO(synk): M == 1 divides by zero here, same as the PyTorch original.
    norm = 1.0 / (m * (m - 1.0))
    sxx = jnp.sum(out_xx)
    syy = jnp.sum(out_yy)
    if loss_type == "critic":
        # Every padded off-diagonal pair contributed exactly exp(-alpha*bu);
        # padded diagonal entries were zeroed by the eye mask.
        n_pad_off = M_pad * M_pad - M * M - (M_pad - M)
        sxx = sxx - jnp.float32(n_pad_off * math.exp(-alpha * float(bu)))
        return norm * sxx - norm * syy
    else:
        sxy = jnp.sum(out_xy)
        return norm * sxx + norm * syy - 2.0 * sxy / (m * m)


def _reference(source, target, loss_type, bu=4.0, bl=0.25, fix_sigma=1.0):
    """Pure-JAX reference mirroring the PyTorch module, for a sanity check."""
    M = source.shape[0]
    if target.shape[0] != M:
        target = target[:M, :]

    def phi(x, y):
        d = x[None, :, :] - y[:, None, :]
        return jnp.sum(d * d, axis=2)

    L2_XX = phi(source, source)
    L2_YY = phi(target, target)
    L2_XY = phi(source, target)
    alpha = 1.0 / (2.0 * fix_sigma)
    m = float(M)
    norm = 1.0 / (m * (m - 1.0))
    if loss_type == "critic":
        XX_u = jnp.exp(-alpha * jnp.minimum(L2_XX, bu))
        YY_l = jnp.exp(-alpha * jnp.maximum(L2_YY, bl))
        XX = norm * (jnp.sum(XX_u) - jnp.sum(jnp.diagonal(XX_u)))
        YY = norm * (jnp.sum(YY_l) - jnp.sum(jnp.diagonal(YY_l)))
        return XX - YY
    else:
        XX_u = jnp.exp(-alpha * L2_XX)
        YY_u = jnp.exp(-alpha * L2_YY)
        XY_l = jnp.exp(-alpha * L2_XY)
        XX = norm * (jnp.sum(XX_u) - jnp.sum(jnp.diagonal(XX_u)))
        YY = norm * (jnp.sum(YY_u) - jnp.sum(jnp.diagonal(YY_u)))
        XY = jnp.mean(XY_l)
        return XX + YY - 2.0 * XY


if __name__ == "__main__":
    key = jax.random.PRNGKey(0)

    # (M, N, D): N > M exercises the [:M] slice; M not a multiple of 8
    # exercises row padding (huge-norm sentinels + analytic critic fix);
    # M > 256 exercises the multi-tile upper-triangular grid.
    cases = [(8, 10, 32), (20, 25, 40), (300, 300, 48)]

    for M, N, D in cases:
        key, k_s, k_t = jax.random.split(key, 3)
        # Scale so pairwise distances give non-negligible kernel values.
        source = 0.25 * jax.random.normal(k_s, (M, D), dtype=jnp.float32)
        target = 0.25 * jax.random.normal(k_t, (N, D), dtype=jnp.float32)

        loss_critic = mmd_loss(source, target, loss_type="critic")
        loss_gen = mmd_loss(source, target, loss_type="gen")
        jax.block_until_ready((loss_critic, loss_gen))

        ref_critic = _reference(source, target, "critic")
        ref_gen = _reference(source, target, "gen")
        assert jnp.allclose(loss_critic, ref_critic, rtol=1e-4, atol=1e-4), (
            ("critic", M, N, D), loss_critic, ref_critic)
        assert jnp.allclose(loss_gen, ref_gen, rtol=1e-4, atol=1e-4), (
            ("gen", M, N, D), loss_gen, ref_gen)

    print("KERNEL_OK")
</pallas_src>

<mosaic_0001>
module attributes {stable_mosaic.version = 11 : i64} {
  func.func @kernel(%arg0: i32, %arg1: i32, %arg2: memref<8x128xf32, #tpu.memory_space<vmem>>, %arg3: memref<8x128xf32, #tpu.memory_space<vmem>>, %arg4: memref<8x128xf32, #tpu.memory_space<vmem>>, %arg5: memref<8x128xf32, #tpu.memory_space<vmem>>, %arg6: memref<8x1xf32, #tpu.memory_space<vmem>>, %arg7: memref<1x8xf32, #tpu.memory_space<vmem>>, %arg8: memref<8x1xf32, #tpu.memory_space<vmem>>, %arg9: memref<1x8xf32, #tpu.memory_space<vmem>>, %arg10: memref<8x1xf32, #tpu.memory_space<vmem>>, %arg11: memref<1x8xf32, #tpu.memory_space<vmem>>, %arg12: memref<1x1x8xf32, #tpu.memory_space<vmem>>, %arg13: memref<1x1x8xf32, #tpu.memory_space<vmem>>, %arg14: memref<1x1x8xf32, #tpu.memory_space<vmem>>) attributes {dimension_semantics = [#tpu.dimension_semantics<parallel>, #tpu.dimension_semantics<arbitrary>], iteration_bounds = array<i64: 1, 1>, scalar_prefetch = 0 : i64, scratch_operands = 0 : i64, tpu.core_type = #tpu.core_type<tc>, window_params = [{transform_indices = @transform_0, window_bounds = array<i64: 8, 128>}, {transform_indices = @transform_1, window_bounds = array<i64: 8, 128>}, {transform_indices = @transform_2, window_bounds = array<i64: 8, 128>}, {transform_indices = @transform_3, window_bounds = array<i64: 8, 128>}, {transform_indices = @transform_4, window_bounds = array<i64: 8, 1>}, {transform_indices = @transform_5, window_bounds = array<i64: 1, 8>}, {transform_indices = @transform_6, window_bounds = array<i64: 8, 1>}, {transform_indices = @transform_7, window_bounds = array<i64: 1, 8>}, {transform_indices = @transform_8, window_bounds = array<i64: 8, 1>}, {transform_indices = @transform_9, window_bounds = array<i64: 1, 8>}, {transform_indices = @transform_10, window_bounds = array<i64: 1, 1, 8>}, {transform_indices = @transform_11, window_bounds = array<i64: 1, 1, 8>}, {transform_indices = @transform_12, window_bounds = array<i64: 1, 1, 8>}]} {
    %c0_i32 = arith.constant 0 : i32
    %0 = arith.cmpi eq, %arg1, %c0_i32 : i32
    %1 = arith.extui %0 : i1 to i32
    %c0_i32_0 = arith.constant 0 : i32
    %2 = arith.cmpi ne, %1, %c0_i32_0 : i32
    scf.if %2 {
      %cst = arith.constant 0.000000e+00 : f32
      %6 = vector.broadcast %cst : f32 to vector<1x1x8xf32>
      %c0 = arith.constant 0 : index
      %c0_2 = arith.constant 0 : index
      %c0_3 = arith.constant 0 : index
      %7 = vector.load %arg12[%c0, %c0_2, %c0_3] : memref<1x1x8xf32, #tpu.memory_space<vmem>>, vector<1x1x8xf32>
      tpu.vector_store %arg12[%c0, %c0_2, %c0_3], %6 {strides = array<i32>} : memref<1x1x8xf32, #tpu.memory_space<vmem>>, vector<1x1x8xf32>,
      %cst_4 = arith.constant 0.000000e+00 : f32
      %8 = vector.broadcast %cst_4 : f32 to vector<1x1x8xf32>
      %c0_5 = arith.constant 0 : index
      %c0_6 = arith.constant 0 : index
      %c0_7 = arith.constant 0 : index
      %9 = vector.load %arg13[%c0_5, %c0_6, %c0_7] : memref<1x1x8xf32, #tpu.memory_space<vmem>>, vector<1x1x8xf32>
      tpu.vector_store %arg13[%c0_5, %c0_6, %c0_7], %8 {strides = array<i32>} : memref<1x1x8xf32, #tpu.memory_space<vmem>>, vector<1x1x8xf32>,
      %cst_8 = arith.constant 0.000000e+00 : f32
      %10 = vector.broadcast %cst_8 : f32 to vector<1x1x8xf32>
      %c0_9 = arith.constant 0 : index
      %c0_10 = arith.constant 0 : index
      %c0_11 = arith.constant 0 : index
      %11 = vector.load %arg14[%c0_9, %c0_10, %c0_11] : memref<1x1x8xf32, #tpu.memory_space<vmem>>, vector<1x1x8xf32>
      tpu.vector_store %arg14[%c0_9, %c0_10, %c0_11], %10 {strides = array<i32>} : memref<1x1x8xf32, #tpu.memory_space<vmem>>, vector<1x1x8xf32>,
    } else {
    }
    %3 = arith.cmpi sge, %arg1, %arg0 : i32
    %4 = arith.extui %3 : i1 to i32
    %c0_i32_1 = arith.constant 0 : i32
    %5 = arith.cmpi ne, %4, %c0_i32_1 : i32
    scf.if %5 {
      %c0 = arith.constant 0 : index
      %c0_2 = arith.constant 0 : index
      %6 = vector.load %arg2[%c0, %c0_2] : memref<8x128xf32, #tpu.memory_space<vmem>>, vector<8x128xf32>
      %c0_3 = arith.constant 0 : index
      %c0_4 = arith.constant 0 : index
      %7 = vector.load %arg3[%c0_3, %c0_4] : memref<8x128xf32, #tpu.memory_space<vmem>>, vector<8x128xf32>
      %c0_5 = arith.constant 0 : index
      %c0_6 = arith.constant 0 : index
      %8 = vector.load %arg4[%c0_5, %c0_6] : memref<8x128xf32, #tpu.memory_space<vmem>>, vector<8x128xf32>
      %c0_7 = arith.constant 0 : index
      %c0_8 = arith.constant 0 : index
      %9 = vector.load %arg5[%c0_7, %c0_8] : memref<8x128xf32, #tpu.memory_space<vmem>>, vector<8x128xf32>
      %cst = arith.constant dense<0.000000e+00> : vector<8x8xf32>
      %10 = tpu.matmul %6, %7, %cst {dimension_numbers = #tpu.dot_dimension_numbers<[1], [1], [0], [0], [0, 0, 1, 0], [], []>, precision = #tpu.contract_precision<fp32>} : vector<8x128xf32>, vector<8x128xf32>, vector<8x8xf32> -> vector<8x8xf32>
      %c0_9 = arith.constant 0 : index
      %c0_10 = arith.constant 0 : index
      %11 = vector.load %arg6[%c0_9, %c0_10] : memref<8x1xf32, #tpu.memory_space<vmem>>, vector<8x1xf32>
      %c0_11 = arith.constant 0 : index
      %c0_12 = arith.constant 0 : index
      %12 = vector.load %arg7[%c0_11, %c0_12] : memref<1x8xf32, #tpu.memory_space<vmem>>, vector<1x8xf32>
      %13 = vector.broadcast %11 : vector<8x1xf32> to vector<8x8xf32>
      %14 = vector.broadcast %12 : vector<1x8xf32> to vector<8x8xf32>
      %15 = arith.addf %13, %14 : vector<8x8xf32>
      %cst_13 = arith.constant 2.000000e+00 : f32
      %16 = vector.broadcast %cst_13 : f32 to vector<8x8xf32>
      %17 = arith.mulf %16, %10 : vector<8x8xf32>
      %18 = arith.subf %15, %17 : vector<8x8xf32>
      %cst_14 = arith.constant 0.000000e+00 : f32
      %19 = vector.broadcast %cst_14 : f32 to vector<8x8xf32>
      %20 = arith.maximumf %18, %19 : vector<8x8xf32>
      %cst_15 = arith.constant dense<0.000000e+00> : vector<8x8xf32>
      %21 = tpu.matmul %8, %9, %cst_15 {dimension_numbers = #tpu.dot_dimension_numbers<[1], [1], [0], [0], [0, 0, 1, 0], [], []>, precision = #tpu.contract_precision<fp32>} : vector<8x128xf32>, vector<8x128xf32>, vector<8x8xf32> -> vector<8x8xf32>
      %c0_16 = arith.constant 0 : index
      %c0_17 = arith.constant 0 : index
      %22 = vector.load %arg8[%c0_16, %c0_17] : memref<8x1xf32, #tpu.memory_space<vmem>>, vector<8x1xf32>
      %c0_18 = arith.constant 0 : index
      %c0_19 = arith.constant 0 : index
      %23 = vector.load %arg9[%c0_18, %c0_19] : memref<1x8xf32, #tpu.memory_space<vmem>>, vector<1x8xf32>
      %24 = vector.broadcast %22 : vector<8x1xf32> to vector<8x8xf32>
      %25 = vector.broadcast %23 : vector<1x8xf32> to vector<8x8xf32>
      %26 = arith.addf %24, %25 : vector<8x8xf32>
      %cst_20 = arith.constant 2.000000e+00 : f32
      %27 = vector.broadcast %cst_20 : f32 to vector<8x8xf32>
      %28 = arith.mulf %27, %21 : vector<8x8xf32>
      %29 = arith.subf %26, %28 : vector<8x8xf32>
      %cst_21 = arith.constant 0.000000e+00 : f32
      %30 = vector.broadcast %cst_21 : f32 to vector<8x8xf32>
      %31 = arith.maximumf %29, %30 : vector<8x8xf32>
      %cst_22 = arith.constant 4.000000e+00 : f32
      %32 = vector.broadcast %cst_22 : f32 to vector<8x8xf32>
      %33 = arith.minimumf %20, %32 : vector<8x8xf32>
      %cst_23 = arith.constant -5.000000e-01 : f32
      %34 = vector.broadcast %cst_23 : f32 to vector<8x8xf32>
      %35 = arith.mulf %34, %33 : vector<8x8xf32>
      %36 = math.exp %35 : vector<8x8xf32>
      %cst_24 = arith.constant 2.500000e-01 : f32
      %37 = vector.broadcast %cst_24 : f32 to vector<8x8xf32>
      %38 = arith.maximumf %31, %37 : vector<8x8xf32>
      %cst_25 = arith.constant -5.000000e-01 : f32
      %39 = vector.broadcast %cst_25 : f32 to vector<8x8xf32>
      %40 = arith.mulf %39, %38 : vector<8x8xf32>
      %41 = math.exp %40 : vector<8x8xf32>
      %42 = arith.cmpi eq, %arg0, %arg1 : i32
      %43 = arith.extui %42 : i1 to i32
      %c0_i32_26 = arith.constant 0 : i32
      %44 = arith.cmpi ne, %43, %c0_i32_26 : i32
      scf.if %44 {
        %48 = tpu.iota {dimensions = array<i32: 0>} : vector<8x8xi32>
        %49 = tpu.iota {dimensions = array<i32: 1>} : vector<8x8xi32>
        %50 = arith.cmpi eq, %48, %49 : vector<8x8xi32>
        %c0_28 = arith.constant 0 : index
        %c0_29 = arith.constant 0 : index
        %c0_30 = arith.constant 0 : index
        %51 = vector.load %arg12[%c0_28, %c0_29, %c0_30] : memref<1x1x8xf32, #tpu.memory_space<vmem>>, vector<1x1x8xf32>
        %cst_31 = arith.constant 0.000000e+00 : f32
        %52 = vector.broadcast %cst_31 : f32 to vector<8x8xf32>
        %53 = arith.select %50, %52, %36 : vector<8x8xi1>, vector<8x8xf32>
        %cst_32 = arith.constant dense<0.000000e+00> : vector<8xf32>
        %54 = vector.multi_reduction <add>, %53, %cst_32 [0] : vector<8x8xf32> to vector<8xf32>
        %55 = vector.shape_cast %54 : vector<8xf32> to vector<1x8xf32>
        %56 = vector.shape_cast %55 : vector<1x8xf32> to vector<1x1x8xf32>
        %57 = arith.addf %51, %56 : vector<1x1x8xf32>
        %c0_33 = arith.constant 0 : index
        %c0_34 = arith.constant 0 : index
        %c0_35 = arith.constant 0 : index
        %58 = vector.load %arg12[%c0_33, %c0_34, %c0_35] : memref<1x1x8xf32, #tpu.memory_space<vmem>>, vector<1x1x8xf32>
        tpu.vector_store %arg12[%c0_33, %c0_34, %c0_35], %57 {strides = array<i32>} : memref<1x1x8xf32, #tpu.memory_space<vmem>>, vector<1x1x8xf32>,
        %c0_36 = arith.constant 0 : index
        %c0_37 = arith.constant 0 : index
        %c0_38 = arith.constant 0 : index
        %59 = vector.load %arg13[%c0_36, %c0_37, %c0_38] : memref<1x1x8xf32, #tpu.memory_space<vmem>>, vector<1x1x8xf32>
        %cst_39 = arith.constant 0.000000e+00 : f32
        %60 = vector.broadcast %cst_39 : f32 to vector<8x8xf32>
        %61 = arith.select %50, %60, %41 : vector<8x8xi1>, vector<8x8xf32>
        %cst_40 = arith.constant dense<0.000000e+00> : vector<8xf32>
        %62 = vector.multi_reduction <add>, %61, %cst_40 [0] : vector<8x8xf32> to vector<8xf32>
        %63 = vector.shape_cast %62 : vector<8xf32> to vector<1x8xf32>
        %64 = vector.shape_cast %63 : vector<1x8xf32> to vector<1x1x8xf32>
        %65 = arith.addf %59, %64 : vector<1x1x8xf32>
        %c0_41 = arith.constant 0 : index
        %c0_42 = arith.constant 0 : index
        %c0_43 = arith.constant 0 : index
        %66 = vector.load %arg13[%c0_41, %c0_42, %c0_43] : memref<1x1x8xf32, #tpu.memory_space<vmem>>, vector<1x1x8xf32>
        tpu.vector_store %arg13[%c0_41, %c0_42, %c0_43], %65 {strides = array<i32>} : memref<1x1x8xf32, #tpu.memory_space<vmem>>, vector<1x1x8xf32>,
      } else {
      }
      %45 = arith.cmpi ne, %arg0, %arg1 : i32
      %46 = arith.extui %45 : i1 to i32
      %c0_i32_27 = arith.constant 0 : i32
      %47 = arith.cmpi ne, %46, %c0_i32_27 : i32
      scf.if %47 {
        %c0_28 = arith.constant 0 : index
        %c0_29 = arith.constant 0 : index
        %c0_30 = arith.constant 0 : index
        %48 = vector.load %arg12[%c0_28, %c0_29, %c0_30] : memref<1x1x8xf32, #tpu.memory_space<vmem>>, vector<1x1x8xf32>
        %cst_31 = arith.constant dense<0.000000e+00> : vector<8xf32>
        %49 = vector.multi_reduction <add>, %36, %cst_31 [0] : vector<8x8xf32> to vector<8xf32>
        %50 = vector.shape_cast %49 : vector<8xf32> to vector<1x8xf32>
        %51 = vector.shape_cast %50 : vector<1x8xf32> to vector<1x1x8xf32>
        %cst_32 = arith.constant 2.000000e+00 : f32
        %52 = vector.broadcast %cst_32 : f32 to vector<1x1x8xf32>
        %53 = arith.mulf %52, %51 : vector<1x1x8xf32>
        %54 = arith.addf %48, %53 : vector<1x1x8xf32>
        %c0_33 = arith.constant 0 : index
        %c0_34 = arith.constant 0 : index
        %c0_35 = arith.constant 0 : index
        %55 = vector.load %arg12[%c0_33, %c0_34, %c0_35] : memref<1x1x8xf32, #tpu.memory_space<vmem>>, vector<1x1x8xf32>
        tpu.vector_store %arg12[%c0_33, %c0_34, %c0_35], %54 {strides = array<i32>} : memref<1x1x8xf32, #tpu.memory_space<vmem>>, vector<1x1x8xf32>,
        %c0_36 = arith.constant 0 : index
        %c0_37 = arith.constant 0 : index
        %c0_38 = arith.constant 0 : index
        %56 = vector.load %arg13[%c0_36, %c0_37, %c0_38] : memref<1x1x8xf32, #tpu.memory_space<vmem>>, vector<1x1x8xf32>
        %cst_39 = arith.constant dense<0.000000e+00> : vector<8xf32>
        %57 = vector.multi_reduction <add>, %41, %cst_39 [0] : vector<8x8xf32> to vector<8xf32>
        %58 = vector.shape_cast %57 : vector<8xf32> to vector<1x8xf32>
        %59 = vector.shape_cast %58 : vector<1x8xf32> to vector<1x1x8xf32>
        %cst_40 = arith.constant 2.000000e+00 : f32
        %60 = vector.broadcast %cst_40 : f32 to vector<1x1x8xf32>
        %61 = arith.mulf %60, %59 : vector<1x1x8xf32>
        %62 = arith.addf %56, %61 : vector<1x1x8xf32>
        %c0_41 = arith.constant 0 : index
        %c0_42 = arith.constant 0 : index
        %c0_43 = arith.constant 0 : index
        %63 = vector.load %arg13[%c0_41, %c0_42, %c0_43] : memref<1x1x8xf32, #tpu.memory_space<vmem>>, vector<1x1x8xf32>
        tpu.vector_store %arg13[%c0_41, %c0_42, %c0_43], %62 {strides = array<i32>} : memref<1x1x8xf32, #tpu.memory_space<vmem>>, vector<1x1x8xf32>,
      } else {
      }
    } else {
    }
    return
  }
  func.func @transform_0(%arg0: i32, %arg1: i32) -> (i32, i32) {
    %c0_i32 = arith.constant 0 : i32
    %c0_i32_0 = arith.constant 0 : i32
    return %arg0, %c0_i32 : i32, i32
  }
  func.func @transform_1(%arg0: i32, %arg1: i32) -> (i32, i32) {
    %0 = arith.maxsi %arg0, %arg1 : i32
    %c0_i32 = arith.constant 0 : i32
    %c0_i32_0 = arith.constant 0 : i32
    return %0, %c0_i32 : i32, i32
  }
  func.func @transform_2(%arg0: i32, %arg1: i32) -> (i32, i32) {
    %c0_i32 = arith.constant 0 : i32
    %c0_i32_0 = arith.constant 0 : i32
    return %arg0, %c0_i32 : i32, i32
  }
  func.func @transform_3(%arg0: i32, %arg1: i32) -> (i32, i32) {
    %0 = arith.maxsi %arg0, %arg1 : i32
    %c0_i32 = arith.constant 0 : i32
    %c0_i32_0 = arith.constant 0 : i32
    return %0, %c0_i32 : i32, i32
  }
  func.func @transform_4(%arg0: i32, %arg1: i32) -> (i32, i32) {
    %c0_i32 = arith.constant 0 : i32
    %c0_i32_0 = arith.constant 0 : i32
    return %arg0, %c0_i32 : i32, i32
  }
  func.func @transform_5(%arg0: i32, %arg1: i32) -> (i32, i32) {
    %0 = arith.maxsi %arg0, %arg1 : i32
    %c0_i32 = arith.constant 0 : i32
    %c0_i32_0 = arith.constant 0 : i32
    return %c0_i32, %0 : i32, i32
  }
  func.func @transform_6(%arg0: i32, %arg1: i32) -> (i32, i32) {
    %c0_i32 = arith.constant 0 : i32
    %c0_i32_0 = arith.constant 0 : i32
    return %arg0, %c0_i32 : i32, i32
  }
  func.func @transform_7(%arg0: i32, %arg1: i32) -> (i32, i32) {
    %0 = arith.maxsi %arg0, %arg1 : i32
    %c0_i32 = arith.constant 0 : i32
    %c0_i32_0 = arith.constant 0 : i32
    return %c0_i32, %0 : i32, i32
  }
  func.func @transform_8(%arg0: i32, %arg1: i32) -> (i32, i32) {
    %0 = arith.maxsi %arg0, %arg1 : i32
    %c0_i32 = arith.constant 0 : i32
    %c0_i32_0 = arith.constant 0 : i32
    return %0, %c0_i32 : i32, i32
  }
  func.func @transform_9(%arg0: i32, %arg1: i32) -> (i32, i32) {
    %c0_i32 = arith.constant 0 : i32
    %c0_i32_0 = arith.constant 0 : i32
    return %c0_i32, %arg0 : i32, i32
  }
  func.func @transform_10(%arg0: i32, %arg1: i32) -> (i32, i32, i32) {
    %c0_i32 = arith.constant 0 : i32
    %c0_i32_0 = arith.constant 0 : i32
    %c0_i32_1 = arith.constant 0 : i32
    return %arg0, %c0_i32, %c0_i32_0 : i32, i32, i32
  }
  func.func @transform_11(%arg0: i32, %arg1: i32) -> (i32, i32, i32) {
    %c0_i32 = arith.constant 0 : i32
    %c0_i32_0 = arith.constant 0 : i32
    %c0_i32_1 = arith.constant 0 : i32
    return %arg0, %c0_i32, %c0_i32_0 : i32, i32, i32
  }
  func.func @transform_12(%arg0: i32, %arg1: i32) -> (i32, i32, i32) {
    %c0_i32 = arith.constant 0 : i32
    %c0_i32_0 = arith.constant 0 : i32
    %c0_i32_1 = arith.constant 0 : i32
    return %arg0, %c0_i32, %c0_i32_0 : i32, i32, i32
  }
}

</mosaic_0001>

<bundles_post_ra>
// kernel: mmd_loss.1
= control target key start
LH: loop header
LB: loop body
LE: loop exit
PB: predicated region body
PF: predicated region fallthrough
CT: control target
= control target key end

     0   :  { %v1211_v3 = vmov 0.0   ;;  %vm1212_vm0 = vmmov 0   ;;  %s1402_s0 = inlined_call_operand.vmem [shape: f32[8,128], index: 0, kind: input, shape index: {}, may-alias: {0,1}]   ;;  %s1403_s1 = inlined_call_operand.vmem [shape: f32[8,128], index: 1, kind: input, shape index: {}, may-alias: {0,1}]   ;;  %s1404_s2 = inlined_call_operand.vmem [shape: f32[8,128], index: 2, kind: input, shape index: {}, may-alias: {2,3}]   ;;  %s1405_s3 = inlined_call_operand.vmem [shape: f32[8,128], index: 3, kind: input, shape index: {}, may-alias: {2,3}]   ;;  %s1406_s4 = inlined_call_operand.vmem [shape: f32[8,1], index: 4, kind: input, shape index: {}, may-alias: {4,8}]   ;;  %s1407_s5 = inlined_call_operand.vmem [shape: f32[1,8], index: 5, kind: input, shape index: {}]   ;;  %s1408_s6 = inlined_call_operand.vmem [shape: f32[8,1], index: 6, kind: input, shape index: {}]   ;;  %s1409_s7 = inlined_call_operand.vmem [shape: f32[1,8], index: 7, kind: input, shape index: {}, may-alias: {7,9}]   ;;  %s1410_s8 = inlined_call_operand.vmem [shape: f32[8,1], index: 8, kind: input, shape index: {}, may-alias: {4,8}]   ;;  %s1411_s9 = inlined_call_operand.vmem [shape: f32[1,8], index: 9, kind: input, shape index: {}, may-alias: {7,9}]   ;;  %s1412_s10 = inlined_call_operand.vmem [shape: f32[1,1,8], index: 10, kind: output, shape index: {0}]   ;;  %s1413_s11 = inlined_call_operand.vmem [shape: f32[1,1,8], index: 11, kind: output, shape index: {1}]   ;;  %s1414_s12 = inlined_call_operand.hbm [shape: f32[1,1,8], index: 12, kind: output, shape index: {2}]  }
   0x1   :  { %v52_v0 = vld [vmem:[%s1403_s1] sm:$0xff]  ;;  %1098 = vmatprep.subr.mxu0 %v1211_v3  ;;  %1128 = vmatprep.subr.mxu1 %v1211_v3 }
   0x2   :  { %v54_v1 = vld [vmem:[%s1405_s3] sm:$0xff]  ;;  %v1291_v4 = vand.u32 4294901760, %v52_v0  ;;  %1100 = vmatprep.mubr.msk.f32.mxu0 %vm1212_vm0, %v1211_v3  ;;  %1130 = vmatprep.mubr.msk.f32.mxu1 %vm1212_vm0, %v1211_v3 }
   0x3   :  { %v51_v2 = vld [vmem:[%s1402_s0] sm:$0xff]  ;;  %v1293_v5 = vand.u32 4294901760, %v54_v1 }
   0x4   :  { %v1295_v6 = vand.u32 4294901760, %v51_v2  ;;  %v53_v7 = vld [vmem:[%s1404_s2] sm:$0xff] }
   0x5   :  { %v1304_v8 = vand.u32 4294901760, %v53_v7 }
   0x6   :  { %18 = vsyncpa [#allocation3], 0  ;;  %1099 = vmatpush3.xpose.msra.mxu0 %v1291_v4  ;;  %v133_v9 = vsub.f32 %v52_v0, %v1291_v4  ;;  %1129 = vmatpush3.xpose.msra.mxu1 %v1293_v5  ;;  %v596_v10 = vsub.f32 %v54_v1, %v1293_v5  ;;  %v122_v11 = vsub.f32 %v51_v2, %v1295_v6  ;;  %v501_v12 = vld [vmem:[%s1406_s4] sm:$0xff]  ;;  %v1213_v17 = vmov 0   ;;  %s1214_s29 = smov [#allocation2]  }
   0x7   :  { %1103 = vmatprep.subr.mxu0 %v1211_v3  ;;  %1133 = vmatprep.subr.mxu1 %v1211_v3  ;;  %v585_v13 = vsub.f32 %v53_v7, %v1304_v8  ;;  %v964_v22 = vld [vmem:[%s1408_s6] sm:$0xff]  ;;  %vm43_vm1 = vcmask 57344   ;;  %s1060_s30 = sshll.u32 %s1214_s29, 4  ;;  %s1061_s30 = int_to_ptr.vmem [resolvable:$true] %s1060_s30 }
   0x8   :  { %v123_v14 = vand.u32 4294901760, %v122_v11  ;;  %v134_v15 = vand.u32 4294901760, %v133_v9  ;;  %v597_v16 = vand.u32 4294901760, %v596_v10  ;;  %1182 = vset.pattern.permute.xlu0 %v1213_v17  ;;  %44 = vst.msk [vmem:[%s1412_s10] sm:$0x1] %vm43_vm1, %v1211_v3  ;;  %s1187_s13 = scalar_lea.vmem %s1061_s30, 16  ;;  %p1192_p1 = scmp.lt.s32.totalorder %s1061_s30, %s1061_s30 }
   0x9   :  { %v586_v18 = vand.u32 4294901760, %v585_v13  ;;  %505 = vperm.xlu0 %1182, %v501_v12   ;;  %45 = vst.msk [vmem:[%s1413_s11] sm:$0x1] %vm43_vm1, %v1211_v3  ;;  %46 = vst.msk [vmem:[#allocation2] sm:$0x1] %vm43_vm1, %v1211_v3  ;;  %p1188_p0 = scmp.ne.s32.totalorder %s1061_s30, %s1187_s13  ;;  %s1191_s14 = scalar_lea.vmem %s1061_s30, 32 }
   0xa   :  { %v124_v19 = vsub.f32 %v122_v11, %v123_v14  ;;  %v135_v20 = vsub.f32 %v133_v9, %v134_v15  ;;  %v598_v21 = vsub.f32 %v596_v10, %v597_v16  ;;  %p1193_p2 = scmp.lt.s32.totalorder %s1191_s14, %s1187_s13 }
   0xb   :  { %v587_v23 = vsub.f32 %v585_v13, %v586_v18 }
   0xc   :  { %v125_v24 = vand.u32 4294901760, %v124_v19  ;;  %v136_v25 = vand.u32 4294901760, %v135_v20  ;;  %v599_v26 = vand.u32 4294901760, %v598_v21  ;;  %p1194_p3 = por %p1193_p2, %p1192_p1 }
   0xd   :  { %v588_v27 = vand.u32 4294901760, %v587_v23  ;;  %968 = vperm.xlu0 %1182, %v964_v22  }
   0xe   :  { %1101 = vmatmul.mubr.f32.vlgmr.msra.gmra.mrb[0].mxu0 %v125_v24  ;;  %p1195_p4 = pnand %p1194_p3, %p1188_p0 }
   0xf   :  { %1104 = vmatpush3.xpose.msra.mxu0 %v136_v25  ;;  %1131 = vmatmul.mubr.f32.vlgmr.msra.gmra.mrb[0].mxu1 %v588_v27 }
  0x10   :  { %1134 = vmatpush3.xpose.msra.mxu1 %v599_v26  ;;  %1105 = vmatprep.mubr.msk.f32.mxu0 %vm1212_vm0, %v1211_v3 }
  0x11   :  { %1108 = vmatprep.subr.mxu0 %v1211_v3  ;;  %1135 = vmatprep.mubr.msk.f32.mxu1 %vm1212_vm0, %v1211_v3 }
  0x12   :  { %1138 = vmatprep.subr.mxu1 %v1211_v3 }
  0x16   :  { %1106 = vmatmul.mubr.f32.vlgmr.msra.gmra.mrb[0].mxu0 %v1295_v6 }
  0x17   :  { %1109 = vmatpush3.xpose.msra.mxu0 %v133_v9  ;;  %1136 = vmatmul.mubr.f32.vlgmr.msra.gmra.mrb[0].mxu1 %v1304_v8 }
  0x18   :  { %1139 = vmatpush3.xpose.msra.mxu1 %v596_v10  ;;  %1110 = vmatprep.mubr.msk.f32.mxu0 %vm1212_vm0, %v1211_v3 }
  0x19   :  { %1113 = vmatprep.subr.mxu0 %v1211_v3  ;;  %1140 = vmatprep.mubr.msk.f32.mxu1 %vm1212_vm0, %v1211_v3 }
  0x1a   :  { %1143 = vmatprep.subr.mxu1 %v1211_v3 }
  0x1e   :  { %1111 = vmatmul.mubr.f32.vlgmr.msra.gmra.mrb[0].mxu0 %v122_v11 }
  0x1f   :  { %1114 = vmatpush3.xpose.msra.mxu0 %v1291_v4  ;;  %1141 = vmatmul.mubr.f32.vlgmr.msra.gmra.mrb[0].mxu1 %v585_v13 }
  0x20   :  { %1144 = vmatpush3.xpose.msra.mxu1 %v1293_v5  ;;  %1115 = vmatprep.mubr.msk.f32.mxu0 %vm1212_vm0, %v1211_v3 }
  0x21   :  { %1118 = vmatprep.subr.mxu0 %v1211_v3  ;;  %1145 = vmatprep.mubr.msk.f32.mxu1 %vm1212_vm0, %v1211_v3 }
  0x22   :  { %1148 = vmatprep.subr.mxu1 %v1211_v3 }
  0x26   :  { %1116 = vmatmul.mubr.f32.vlgmr.msra.gmra.mrb[0].mxu0 %v123_v14 }
  0x27   :  { %1119 = vmatpush3.xpose.msra.mxu0 %v134_v15  ;;  %1146 = vmatmul.mubr.f32.vlgmr.msra.gmra.mrb[0].mxu1 %v586_v18 }
  0x28   :  { %1149 = vmatpush3.xpose.msra.mxu1 %v597_v16  ;;  %1120 = vmatprep.mubr.msk.f32.mxu0 %vm1212_vm0, %v1211_v3 }
  0x29   :  { %1123 = vmatprep.subr.mxu0 %v1211_v3  ;;  %1150 = vmatprep.mubr.msk.f32.mxu1 %vm1212_vm0, %v1211_v3 }
  0x2a   :  { %1153 = vmatprep.subr.mxu1 %v1211_v3 }
  0x2e   :  { %1121 = vmatmul.mubr.f32.vlgmr.msra.gmra.mrb[0].mxu0 %v1295_v6 }
  0x2f   :  { %1124 = vmatpush3.xpose.msra.mxu0 %v1291_v4  ;;  %1151 = vmatmul.mubr.f32.vlgmr.msra.gmra.mrb[0].mxu1 %v1304_v8 }
  0x30   :  { %1154 = vmatpush3.xpose.msra.mxu1 %v1293_v5  ;;  %1125 = vmatprep.mubr.msk.f32.mxu0 %vm1212_vm0, %v1211_v3 }
  0x31   :  { %1155 = vmatprep.mubr.msk.f32.mxu1 %vm1212_vm0, %v1211_v3 }
  0x36   :  { %1126 = vmatmul.mubr.f32.vlgmr.msra.gmra.mrb[0].mxu0 %v1295_v6 }
  0x37   :  { %1156 = vmatmul.mubr.f32.vlgmr.msra.gmra.mrb[0].mxu1 %v1304_v8 }
  0x38   :  { %1198 = shalt.err (!%p1195_p4)
}
  0x39   :  { %s1199_s17 = scalar_lea.hbm %s1414_s12, 16 }
  0x3a   :  { %p1200_p5 = scmp.ne.s32.totalorder %s1414_s12, %s1199_s17  ;;  %p1203_p6 = scmp.lt.u32.totalorder %s1199_s17, %s1414_s12 }
  0x3c   :  { %p1205_p7 = pnand %p1203_p6, %p1200_p5 }
  0x3e   :  { %1208 = shalt.err (!%p1205_p7)
}
  0x3f   :  { %1063 = dma.vmem_to_hbm [thread:$0]  %s1061_s30, 16, %s1414_s12, [#allocation3]   ;;  %v1072_v29 = vld [vmem:[%s1407_s5] ss:$0 sm:$0xff]  ;;  %v993_v50 = vlaneseq  ;;  %vm1000_vm3 = vcmask 64512  }
  0x40   :  { %v1073_v30 = vld [vmem:[%s1409_s7] ss:$0 sm:$0xff] }
  0x41   :  { %v994_v51 = vshrl.u32 %v993_v50, 7  ;;  %v996_v52 = vand.u32 127, %v993_v50  ;;  %v998_v5 = vld [vmem:[%s1412_s10] sm:$0x1] }
  0x42   :  { %v1011_v7 = vld [vmem:[%s1413_s11] sm:$0x1] }
  0x43   :  { %vm997_vm2 = vcmp.eq.s32.totalorder %v994_v51, %v996_v52 }
  0x88   :  { %v506_v28 = vpop.permute.xlu0 %505 }
  0x89   :  { %v514_v33 = vadd.f32 %v1072_v29, %v506_v28 }
  0x8c   :  { %v969_v31 = vpop.permute.xlu0 %968 }
  0x8d   :  { %v977_v37 = vadd.f32 %v1073_v30, %v969_v31 }
 0x109   :  { %v497_v32 = vpop.f32.mrb[0].mxu0 }
 0x10a   :  { %v515_v34 = vmul.f32 2.0, %v497_v32  ;;  %v960_v35 = vpop.f32.mrb[0].mxu1  ;;  %v1127_v36 = vpop.f32.mrb[1].mxu0 }
 0x10b   :  { %v978_v38 = vmul.f32 2.0, %v960_v35  ;;  %v1157_v39 = vpop.f32.mrb[1].mxu1 }
 0x10c   :  { %v516_v40 = vsub.f32 %v514_v33, %v515_v34 }
 0x10d   :  { %v979_v41 = vsub.f32 %v977_v37, %v978_v38 }
 0x10e   :  { %v517_v42 = vmax.f32 %v516_v40, 0.0 }
 0x10f   :  { %v980_v43 = vmax.f32 %v979_v41, 0.0 }
 0x110   :  { %v981_v44 = vmin.f32 %v517_v42, 4.0 }
 0x111   :  { %v985_v45 = vmax.f32 %v980_v43, 0.25 }
 0x112   :  { %v982_v46 = vmul.f32 -0.5, %v981_v44 }
 0x113   :  { %v986_v47 = vmul.f32 -0.5, %v985_v45 }
 0x114   :  { %v983_v48 = vmul.f32 1.442695, %v982_v46 }
 0x115   :  { %v987_v49 = vmul.f32 1.442695, %v986_v47 }
 0x116   :  { %1183 = vpow2.f32 %v983_v48 }
 0x117   :  { %1185 = vpow2.f32 %v987_v49 }
 0x120   :  { %v1184_v53 = vpop.eup %1183 }
 0x121   :  { %v1186_v54 = vpop.eup %1185  ;;  %v999_v55 = vsel %vm997_vm2, 0.0, %v1184_v53 }
 0x122   :  { %v1001_v56 = vsel %vm1000_vm3, %v999_v55, 0.0  ;;  %v1012_v57 = vsel %vm997_vm2, 0.0, %v1186_v54 }
 0x123   :  { %v1002_v58 = vrot.slane %v1001_v56, 4  ;;  %v1013_v59 = vsel %vm1000_vm3, %v1012_v57, 0.0 }
 0x124   :  { %v1014_v60 = vrot.slane %v1013_v59, 4 }
 0x125   :  { %v1003_v61 = vadd.f32 %v1002_v58, %v1001_v56 }
 0x126   :  { %v1015_v62 = vadd.f32 %v1014_v60, %v1013_v59 }
 0x127   :  { %v1004_v63 = vrot.slane %v1003_v61, 2 }
 0x128   :  { %v1016_v0 = vrot.slane %v1015_v62, 2 }
 0x129   :  { %v1005_v1 = vadd.f32 %v1004_v63, %v1003_v61 }
 0x12a   :  { %v1017_v2 = vadd.f32 %v1016_v0, %v1015_v62 }
 0x12b   :  { %v1006_v3 = vrot.slane %v1005_v1, 1 }
 0x12c   :  { %v1018_v4 = vrot.slane %v1017_v2, 1 }
 0x12d   :  { %v1007_v6 = vadd.f32 %v1006_v3, %v1005_v1 }
 0x12e   :  { %v1019_v8 = vadd.f32 %v1018_v4, %v1017_v2 }
 0x12f   :  { %v1008_v9 = vadd.f32 %v1007_v6, %v998_v5 }
 0x130   :  { %v1020_v10 = vadd.f32 %v1019_v8, %v1011_v7 }
 0x131   :  { %1010 = vst.msk [vmem:[%s1412_s10] sm:$0x1] %vm43_vm1, %v1008_v9 }
 0x132   :  { %1021 = vst.msk [vmem:[%s1413_s11] sm:$0x1] %vm43_vm1, %v1020_v10 }
 0x133   :  { %1209 = dma.done.wait [#allocation3], 16  }
 0x134   :  { %1210 = vsyncadd [#allocation3], 4294967280 }
 0x135   :  { %1071 = vsyncpa [#allocation3], 1 }

</bundles_post_ra>
